<compile_context>
chip_gen: v6e
topology: v6e:2x2x1
jax: 0.10.0
libtpu: 0.0.40
codegen_flags: <defaults>
</compile_context>

<pallas_src>
import functools

import jax
import jax.numpy as jnp
from jax import lax
from jax.experimental import pallas as pl
from jax.experimental.pallas import tpu as pltpu


# ---------------------------------------------------------------------------
# helpers
# ---------------------------------------------------------------------------

def _round_up(x, m):
    return ((x + m - 1) // m) * m


def _divisors_desc(n):
    ds = set()
    i = 1
    while i * i <= n:
        if n % i == 0:
            ds.add(i)
            ds.add(n // i)
        i += 1
    return sorted(ds, reverse=True)


def _pick_tile(total, cap, aligns):
    """Largest t dividing `total` with t <= cap, preferring `aligns` in order.

    A full-extent block (t == total) is always legal w.r.t. the (8, 128)
    constraint, so it is returned directly when it fits the cap.
    """
    if total <= cap:
        return total
    divs = _divisors_desc(total)
    for align in aligns:
        for d in divs:
            if d <= cap and d % align == 0:
                return d
    for d in divs:
        if d <= cap:
            return d
    return total


def _vmem_capacity_bytes():
    """Per-core VMEM capacity; conservative 64 MiB (v7x) fallback."""
    try:
        info = pltpu.get_tpu_info()
        cap = int(getattr(info, "vmem_capacity_bytes", 0) or 0)
        if cap > 0:
            return cap
    except Exception:
        pass
    return 64 * 1024 * 1024


# ---------------------------------------------------------------------------
# kernel
# ---------------------------------------------------------------------------

def _matvec_kernel(v_ref, at_ref, o_ref, *, precision):
    # grid = (Mp // tm, Np // tk); reduction axis (k) is last / innermost.
    k = pl.program_id(1)

    @pl.when(k == 0)
    def _():
        o_ref[...] = jnp.zeros_like(o_ref)

    # (1, tk) @ (tk, tm) -> (1, tm) partial product; accumulate directly into
    # the (f32, k-resident) output tile -- no scratch accumulator needed.
    o_ref[...] += jnp.dot(
        v_ref[...].astype(at_ref.dtype), at_ref[...],
        preferred_element_type=jnp.float32, precision=precision,
    )


def tomo_matvec(at, v_flat, *, tm=None, tk=None):
    """y (Mp,) = A @ v, with A passed transposed (and padded) as `at` (Np, Mp)."""
    Np, Mp = at.shape
    itemsize = jnp.dtype(at.dtype).itemsize

    capacity = _vmem_capacity_bytes()
    # Budget for the pipelined AT tiles (the only real HBM stream):
    # ~60% of per-core VMEM (~38 MiB on v7x, ~77 MiB on v5e/v6e's 128 MiB).
    at_budget = int(0.60 * capacity)

    if tm is None or tk is None:
        max_elems = max(128 * 128, at_budget // (2 * itemsize))
        if tk is None:
            # Maximize reduction depth first: fewer k passes over the
            # 1-sublane-wide output tile; leave room for tm >= min(Mp, 512).
            tm_floor = min(Mp, 512)
            tk_cap = min(Np, max(128, max_elems // tm_floor))
            tk = _pick_tile(Np, tk_cap, (512, 256, 128))
        if tm is None:
            tm_cap = min(Mp, max(128, max_elems // tk))
            if Mp >= 256:
                # Keep >= 2 blocks on the parallel m axis so v7x's two
                # TensorCores both get work (negligible cost on v5e/v6e).
                tm_cap = min(tm_cap, Mp // 2)
            tm = _pick_tile(Mp, tm_cap, (512, 256, 128))
    assert Mp % tm == 0 and Np % tk == 0, "tile sizes must divide padded (Mp, Np)"

    grid = (Mp // tm, Np // tk)
    n_steps = grid[0] * grid[1]
    at_tile_bytes = tk * tm * itemsize
    # Triple-buffer the AT stream when tiles had to shrink (many steps) and
    # the extra buffer still fits; hides the ~0.35us per-step bookkeeping.
    at_bufs = 3 if (n_steps >= 4 and 3 * at_tile_bytes <= int(0.70 * capacity)) else 2

    v_row = v_flat.reshape(1, Np).astype(jnp.float32)

    at_spec_kwargs = {}
    if at_bufs == 3:
        at_spec_kwargs["pipeline_mode"] = pl.Buffered(3)

    grid_spec = pl.GridSpec(
        grid=grid,
        in_specs=[
            # Per-step (1, tk) chunk of the flattened image (tiny DMA).
            pl.BlockSpec((1, tk), lambda m, k: (0, k)),
            # Streamed AT tile -- the only real HBM traffic.
            pl.BlockSpec((tk, tm), lambda m, k: (k, m), **at_spec_kwargs),
        ],
        # Output tile resident across the k axis (index_map ignores k),
        # accumulated in place, written back when the m block changes.
        out_specs=pl.BlockSpec((1, tm), lambda m, k: (0, m)),
    )

    # VMEM accounting: 1-row (1, x) blocks are sublane-padded to 8 rows.
    vmem_need = (at_bufs * at_tile_bytes
                 + 2 * 8 * tk * 4      # double-buffered (1, tk) v blocks
                 + 2 * 8 * tm * 4)     # (1, tm) f32 output tile
    vmem_limit = int(min(vmem_need + (4 << 20), int(0.85 * capacity)))
    vmem_limit = max(vmem_limit, min(int(0.85 * capacity), 16 << 20))

    # f32 storage: multi-pass MXU for near-f32 fidelity (hidden under the HBM
    # roofline); bf16 storage: native single-pass.
    precision = (lax.Precision.HIGHEST if at.dtype == jnp.float32
                 else lax.Precision.DEFAULT)

    cost = pl.CostEstimate(
        flops=2 * Mp * Np,
        transcendentals=0,
        bytes_accessed=Np * Mp * itemsize + Np * 4 + Mp * 4,
    )

    y_row = pl.pallas_call(
        functools.partial(_matvec_kernel, precision=precision),
        out_shape=jax.ShapeDtypeStruct((1, Mp), jnp.float32),
        grid_spec=grid_spec,
        compiler_params=pltpu.CompilerParams(
            dimension_semantics=("parallel", "arbitrary"),
            vmem_limit_bytes=vmem_limit,
        ),
        cost_estimate=cost,
    )(v_row, at)

    return y_row.reshape(Mp)


# ---------------------------------------------------------------------------
# module wrapper
# ---------------------------------------------------------------------------

class TomoTorchPallas:
    """JAX/Pallas equivalent of TomoTorch: forward(v) = tomop @ vec(v).

    `store_dtype=jnp.bfloat16` halves the HBM traffic of this bandwidth-bound
    mat-vec (f32 accumulation is kept) at some precision cost; the default
    float32 matches the reference tolerance check.
    """

    def __init__(self, proj_matrix, store_dtype=jnp.float32):
        A = jnp.asarray(proj_matrix, dtype=jnp.float32)
        M, N = A.shape
        self.shape = (M, N)
        self.dtype = A.dtype
        self._M, self._N = M, N
        # Zero-pad to 128-multiples so every tile / lane slice is aligned
        # (avoids masked vst / relayouts for real n_angles*n_det sizes).
        Mp, Np = _round_up(M, 128), _round_up(N, 128)
        if (Mp, Np) != (M, N):
            A = jnp.pad(A, ((0, Mp - M), (0, Np - N)))
        self._Mp, self._Np = Mp, Np
        # Store transposed so the kernel computes the lane-dense row product
        #   y (1, Mp) = v (1, Np) @ AT (Np, Mp).
        self._at = jnp.asarray(A.T, dtype=store_dtype)

    def forward(self, v):
        # TODO(synk): PyTorch path casts to float64; TPU kernel returns float32.
        v_flat = jnp.asarray(v, dtype=jnp.float32).reshape(-1)
        if v_flat.shape[0] != self._N:
            raise ValueError(f"expected {self._N} pixels, got {v_flat.shape[0]}")
        if self._Np != self._N:
            v_flat = jnp.pad(v_flat, (0, self._Np - self._N))
        y = tomo_matvec(self._at, v_flat)
        return y[: self._M]

    def sumnorm_opt(self):
        dim = int(self.shape[1] ** 0.5)
        e = jnp.ones((dim, dim), dtype=jnp.float32)
        col_sum = self.forward(e)
        return jnp.max(col_sum)


def _make_synthetic_projection_matrix(key, m, n):
    # Non-negative, sparse-ish weights mimicking ray/pixel intersection lengths.
    k1, k2 = jax.random.split(key)
    w = jax.random.uniform(k1, (m, n), dtype=jnp.float32)
    mask = (jax.random.uniform(k2, (m, n)) < 0.25).astype(jnp.float32)
    return w * mask


if __name__ == "__main__":
    key = jax.random.PRNGKey(0)
    k_a, k_v, k_a2, k_v2 = jax.random.split(key, 4)

    # --- aligned case: 16x16 image, 16 angles x 16 detectors -> A is (256, 256)
    dim = 16
    M, N = 16 * 16, dim * dim
    proj = _make_synthetic_projection_matrix(k_a, M, N)
    tomo = TomoTorchPallas(proj)
    v = jax.random.uniform(k_v, (dim, dim), dtype=jnp.float32)

    y = jax.block_until_ready(tomo.forward(v))
    y_ref = jnp.dot(proj, v.reshape(-1), precision=lax.Precision.HIGHEST)
    assert y.shape == (M,)
    assert jnp.allclose(y, y_ref, rtol=1e-4, atol=1e-4), \
        float(jnp.max(jnp.abs(y - y_ref)))

    s = jax.block_until_ready(tomo.sumnorm_opt())
    assert jnp.isfinite(s)

    # --- unaligned case exercises the zero-padding path: 12x12 image, M=200
    dim2 = 12
    M2, N2 = 200, dim2 * dim2
    proj2 = _make_synthetic_projection_matrix(k_a2, M2, N2)
    tomo2 = TomoTorchPallas(proj2)
    v2 = jax.random.uniform(k_v2, (dim2, dim2), dtype=jnp.float32)

    y2 = jax.block_until_ready(tomo2.forward(v2))
    y2_ref = jnp.dot(proj2, v2.reshape(-1), precision=lax.Precision.HIGHEST)
    assert y2.shape == (M2,)
    assert jnp.allclose(y2, y2_ref, rtol=1e-4, atol=1e-4)

    print("KERNEL_OK")
</pallas_src>

<mosaic_0001>
module attributes {stable_mosaic.version = 11 : i64} {
  func.func @_matvec_kernel(%arg0: i32, %arg1: i32, %arg2: memref<1x256xf32, #tpu.memory_space<vmem>>, %arg3: memref<256x128xf32, #tpu.memory_space<vmem>>, %arg4: memref<1x128xf32, #tpu.memory_space<vmem>>) attributes {dimension_semantics = [#tpu.dimension_semantics<parallel>, #tpu.dimension_semantics<arbitrary>], iteration_bounds = array<i64: 2, 1>, scalar_prefetch = 0 : i64, scratch_operands = 0 : i64, tpu.core_type = #tpu.core_type<tc>, window_params = [{transform_indices = @transform_0, window_bounds = array<i64: 1, 256>}, {transform_indices = @transform_1, window_bounds = array<i64: 256, 128>}, {transform_indices = @transform_2, window_bounds = array<i64: 1, 128>}]} {
    %c0_i32 = arith.constant 0 : i32
    %0 = arith.cmpi eq, %arg1, %c0_i32 : i32
    %1 = arith.extui %0 : i1 to i32
    %c0_i32_0 = arith.constant 0 : i32
    %2 = arith.cmpi ne, %1, %c0_i32_0 : i32
    scf.if %2 {
      %cst_8 = arith.constant 0.000000e+00 : f32
      %9 = vector.broadcast %cst_8 : f32 to vector<1x128xf32>
      %c0_9 = arith.constant 0 : index
      %c0_10 = arith.constant 0 : index
      %10 = vector.load %arg4[%c0_9, %c0_10] : memref<1x128xf32, #tpu.memory_space<vmem>>, vector<1x128xf32>
      tpu.vector_store %arg4[%c0_9, %c0_10], %9 {strides = array<i32>} : memref<1x128xf32, #tpu.memory_space<vmem>>, vector<1x128xf32>,
    } else {
    }
    %c0 = arith.constant 0 : index
    %c0_1 = arith.constant 0 : index
    %3 = vector.load %arg4[%c0, %c0_1] : memref<1x128xf32, #tpu.memory_space<vmem>>, vector<1x128xf32>
    %c0_2 = arith.constant 0 : index
    %c0_3 = arith.constant 0 : index
    %4 = vector.load %arg2[%c0_2, %c0_3] : memref<1x256xf32, #tpu.memory_space<vmem>>, vector<1x256xf32>
    %c0_4 = arith.constant 0 : index
    %c0_5 = arith.constant 0 : index
    %5 = vector.load %arg3[%c0_4, %c0_5] : memref<256x128xf32, #tpu.memory_space<vmem>>, vector<256x128xf32>
    %cst = arith.constant dense<0.000000e+00> : vector<1x128xf32>
    %6 = tpu.matmul %4, %5, %cst {dimension_numbers = #tpu.dot_dimension_numbers<[1], [0], [0], [1], [0, 0, 1, 1], [], []>, precision = #tpu.contract_precision<fp32>} : vector<1x256xf32>, vector<256x128xf32>, vector<1x128xf32> -> vector<1x128xf32>
    %7 = arith.addf %3, %6 : vector<1x128xf32>
    %c0_6 = arith.constant 0 : index
    %c0_7 = arith.constant 0 : index
    %8 = vector.load %arg4[%c0_6, %c0_7] : memref<1x128xf32, #tpu.memory_space<vmem>>, vector<1x128xf32>
    tpu.vector_store %arg4[%c0_6, %c0_7], %7 {strides = array<i32>} : memref<1x128xf32, #tpu.memory_space<vmem>>, vector<1x128xf32>,
    return
  }
  func.func @transform_0(%arg0: i32, %arg1: i32) -> (i32, i32) {
    %c0_i32 = arith.constant 0 : i32
    %c0_i32_0 = arith.constant 0 : i32
    return %c0_i32, %arg1 : i32, i32
  }
  func.func @transform_1(%arg0: i32, %arg1: i32) -> (i32, i32) {
    %c0_i32 = arith.constant 0 : i32
    return %arg1, %arg0 : i32, i32
  }
  func.func @transform_2(%arg0: i32, %arg1: i32) -> (i32, i32) {
    %c0_i32 = arith.constant 0 : i32
    %c0_i32_0 = arith.constant 0 : i32
    return %c0_i32, %arg0 : i32, i32
  }
}

</mosaic_0001>

<bundles_post_ra>
// kernel: tpu_custom_call.1
= control target key start
LH: loop header
LB: loop body
LE: loop exit
PB: predicated region body
PF: predicated region fallthrough
CT: control target
= control target key end

     0   :  { %7 = vsyncpa [#allocation3], 0  ;;  %s2493_s0 = inlined_call_operand.hbm [shape: f32[1,256], index: 0, kind: input, shape index: {}]   ;;  %s2494_s1 = inlined_call_operand.hbm [shape: f32[256,256], index: 1, kind: input, shape index: {}]   ;;  %s2495_s2 = inlined_call_operand.hbm [shape: f32[1,256], index: 2, kind: output, shape index: {}]  }
   0x1   :  { %8 = vsyncpa [#allocation6], 0 }
   0x2   :  { %10 = vsyncpa [#allocation6 + $0x1], 0 }
   0x3   :  { %11 = vsyncpa [#allocation4], 0 }
   0x4   :  { %13 = vsyncpa [#allocation4 + $0x1], 0  ;;  %s1679_s9 = smov 0   ;;  %s1681_s10 = smov 0  }
   0x5   :  { %s1683_s11 = smov 0   ;;  %s1685_s12 = smov 0  }
   0x6   :  { %s1687_s13 = smov 0   ;;  %s1689_s14 = smov 0  }
   0x7 LB: > { %s1217_s15 = sadd.s32 4294967295, %s1655_s14   ;;  %s1218_s16 = sadd.s32 4294967294, %s1655_s14   ;;  %s1655_s14 = sphi %s1689_s14, %s19_s14   ;;  %s1651_s13 = sphi %s1687_s13, %s2676_s13   ;;  %s1647_s12 = sphi %s1685_s12, %s2675_s12   ;;  %s1643_s11 = sphi %s1683_s11, %s2674_s11   ;;  %s1639_s10 = sphi %s1681_s10, %s2673_s10   ;;  %s1635_s9 = sphi %s1679_s9, %s2672_s9  }
   0x8   : > { %s66_s17 = sadd.s32 1, %s1643_s11  ;;  %p73_p0 = scmp.ne.s32.totalorder %s1643_s11, %s1639_s10 }
   0x9   : > { %p74_p1 = scmp.eq.s32.totalorder %s1655_s14, 0  ;;  %p79_p2 = scmp.ne.s32.totalorder %s1639_s10, %s1635_s9 }
   0xa   : > { %p1717_p3 = scmp.eq.s32.totalorder %s1217_s15, 0  ;;  %p103_p4 = scmp.eq.s32.totalorder %s1217_s15, 1 }
   0xb   : > { %p1721_p5 = por %p74_p1, %p73_p0  ;;  %p109_p6 = scmp.eq.s32.totalorder %s1218_s16, 1 }
   0xc   : > { %p1727_p7 = por %p1717_p3, %p79_p2  ;;  %p1731_p8 = por %p103_p4, %p73_p0 }
   0xd   : > { %p1735_p9 = por %p109_p6, %p79_p2  ;;  %p1219_p10 = scmp.ge.s32.totalorder %s1655_s14, 1 }
   0xe   : > { %s2567_s20 = scalar_select %p1727_p7, 1, 0 }
   0xf   : > { %s2568_s21 = scalar_select %p1731_p8, 1, 0 }
  0x10   : > { %s2569_s22 = scalar_select %p1735_p9, 1, 0 }
  0x11   : > { %p116_p11 = scmp.lt.s32.totalorder %s1655_s14, 3  ;;  %s1657_s24 = smov [#allocation2]  }
  0x12   : > { %s132_s25 = sshll.u32 %s1657_s24, 4  ;;  %p1461_p1 = scmp.lt.s32.totalorder %s1655_s14, 2  ;;  %s133_s25 = int_to_ptr.vmem [resolvable:$true] %s132_s25 }
  0x13   : > { %p1742_p13 = pnand %p1219_p10, %p116_p11  ;;  %s31_s28 = sadd.s32 1, %s1651_s13 }
  0x14   : > { %p1751_p4 = pnand %p1461_p1, %p1721_p5  ;;  %p33_p6 = scmp.ge.s32.totalorder %s31_s28, 2 }
  0x15   : > { %p1448_p0 = pneg %p1742_p13  ;;  %s143_s29 = sand.u32 1, %s1643_s11  }
  0x16   : > { %s1528_s30 = scalar_lea.vmem %s133_s25, 32  ;;  %p1536_p8 = scmp.lt.s32.totalorder %s133_s25, %s133_s25 }
  0x17   : > { %p1757_p2 = pnand %p1448_p0, %p1717_p3  ;;  %p1529_p11 = scmp.ne.s32.totalorder %s133_s25, %s1528_s30 }
  0x18   : > { %p1537_p5 = scmp.lt.s32.totalorder %s1528_s30, %s1528_s30 }
  0x19   : > { %p1519_p10 = pneg %p1757_p2 }
  0x1a   : > { %p1538_p1 = por %p1537_p5, %p1536_p8 }
  0x1b   : > { %p1531_p12 = pnand %p1529_p11, %p1519_p10 }
  0x1d   : > { %p1532_p9 = pneg %p1531_p12 }
  0x1f   : > { %p1539_p7 = pnand %p1538_p1, %p1532_p9 }
  0x21   : > { %1542 = shalt.err (!%p1539_p7)
}
  0x22   : > { %1451 = dma.hbm_to_vmem [thread:$0]  (!%p1757_p2), %s2493_s0, 32, %s133_s25, [#allocation3]  }
  0x23   : > { %s2678_s28 = smov (%p33_p6, %s31_s28), 0  ;;  %s1222_s5 = sshll.u32 %s143_s29, 8 }
  0x24   : > { %s62_s6 = ssub.s32 %s1651_s13, %s2678_s28  ;;  %s1223_s7 = sshll.u32 %s1651_s13, 7 }
  0x25   : > { %p64_p12 = scmp.eq.s32.totalorder %s62_s6, 0  ;;  %s155_s16 = scalar_lea.hbm %s2494_s1, %s1223_s7 }
  0x26   : > { %s147_s19 = scalar_lea.vmem [#allocation5], %s1222_s5  ;;  %s144_s30 = scalar_lea.sflag [#allocation6], %s143_s29 }
  0x27   : > { %s156_s24 = sshll.u32 %s147_s19, 4  ;;  %p1545_p7 = pneg %p1751_p4  ;;  %s157_s24 = int_to_ptr.vmem [resolvable:$true] %s156_s24 }
  0x28   : > { %s1781_s27 = scalar_select %p64_p12, %s1643_s11, %s66_s17  }
  0x29   : > { %s1556_s25 = scalar_lea.vmem %s157_s24, 4096  ;;  %s1658_s3 = smov [#allocation5]  }
  0x2a   : > { %p1557_p8 = scmp.ne.s32.totalorder %s157_s24, %s1556_s25  ;;  %s1561_s4 = sshll.u32 %s1658_s3, 4  ;;  %s1562_s4 = int_to_ptr.vmem [resolvable:$false] %s1561_s4 }
  0x2b   : > { %s1563_s6 = scalar_lea.vmem %s1562_s4, 8192  ;;  %p1564_p2 = scmp.lt.s32.totalorder %s157_s24, %s1562_s4 }
  0x2c   : > { %p1559_p9 = pnand %p1557_p8, %p1545_p7  ;;  %p1565_p6 = scmp.lt.s32.totalorder %s1563_s6, %s1556_s25 }
  0x2e   : > { %p1560_p0 = pneg %p1559_p9  ;;  %p1566_p10 = por %p1565_p6, %p1564_p2 }
  0x30   : > { %p1567_p11 = pnand %p1566_p10, %p1560_p0 }
  0x32   : > { %1570 = shalt.err (!%p1567_p11)
}
  0x33   : > { %s1659_s5 = smov 256   ;;  %s1660_s17 = smov 128  }
  0x34   : > { %s1661_s7 = smov 8   ;;  %168 = sbr.rel (%p1742_p13) target bundleno = 397 (0x18d), region = 28 }
  0x35   : > { %1455 = dma.hbm_to_vmem [thread:$0]  (!%p1751_p4), %s155_s16, 4096, %s157_s24, %s144_s30, %s1659_s5, %s1660_s17, %s1661_s7  }
  0x39   : > { %1622 = dma.done.wait (%p1717_p3), [#allocation3], 32  }
  0x3a   : > { %1624 = vsyncadd (%p1717_p3), [#allocation3], 4294967264  ;;  %s1794_s29 = sand.u32 1, %s1639_s10   ;;  %p2573_p4 = scmp.ne.s32.totalorder %s2567_s20, 0 }
  0x3b   : > { %s1226_s8 = sshll.u32 %s1794_s29, 8  ;;  %s175_s15 = scalar_lea.sflag [#allocation6], %s1794_s29 }
  0x3c   : > { %s1798_s19 = scalar_lea.vmem [#allocation5], %s1226_s8 }
  0x3d   : > { %1626 = dma.done.wait (%p2573_p4), %s175_s15, 4096  }
  0x3e   : > { %1628 = vsyncadd (%p2573_p4), %s175_s15, 4294963200  ;;  %v240_v0 = vlaneseq  ;;  %v238_v2 = vld [vmem:[%s1798_s19 + $0xf8] sm:$0xff]  ;;  %v237_v4 = vld [vmem:[%s1798_s19 + $0xf0] sm:$0xff]  ;;  %s2447_s18 = scalar_lea.vmem [#allocation7], %s1794_s29  ;;  %s1227_s20 = sshll.u32 %s1647_s12, 4 }
  0x3f   : > { %v222_v3 = vld [vmem:[%s1798_s19 + $0x78] sm:$0xff]  ;;  %v1811_v7 = vand.u32 4294901760, %v238_v2  ;;  %v1815_v9 = vand.u32 4294901760, %v237_v4  ;;  %v221_v10 = vld [vmem:[%s1798_s19 + $0x70] sm:$0xff]  ;;  %v236_v11 = vld [vmem:[%s1798_s19 + $0xe8] sm:$0xff]  ;;  %s1127_s23 = sshll.u32 %s2447_s18, 4  ;;  %s1125_s24 = scalar_lea.hbm %s2495_s2, %s1227_s20  ;;  %s1128_s23 = int_to_ptr.vmem [resolvable:$true] %s1127_s23 }
  0x40   : > { %v1804_v1 = vshrl.u32 %v240_v0, 7  ;;  %v1813_v8 = vand.u32 4294901760, %v222_v3  ;;  %v220_v12 = vld [vmem:[%s1798_s19 + $0x68] sm:$0xff]  ;;  %v1820_v13 = vand.u32 4294901760, %v221_v10  ;;  %v1822_v14 = vand.u32 4294901760, %v236_v11  ;;  %v235_v16 = vld [vmem:[%s1798_s19 + $0xe0] sm:$0xff] }
  0x41   : > { %v1824_v15 = vand.u32 4294901760, %v220_v12  ;;  %v219_v17 = vld [vmem:[%s1798_s19 + $0x60] sm:$0xff]  ;;  %v234_v18 = vld [vmem:[%s1798_s19 + $0xd8] sm:$0xff]  ;;  %1230 = vmatprep.subr.mxu0 %v1811_v7  ;;  %v1830_v19 = vand.u32 4294901760, %v235_v16  ;;  %v1837_v22 = vsub.f32 %v238_v2, %v1811_v7  ;;  %v1843_v24 = vld [vmem:[%s1798_s19 + $0xd0] sm:$0xff]  ;;  %v1859_v29 = vsub.f32 %v237_v4, %v1815_v9  ;;  %s1115_s30 = scalar_lea.sflag [#allocation4], %s1794_s29 }
  0x42   : > { %v1832_v20 = vand.u32 4294901760, %v219_v17  ;;  %v1834_v21 = vand.u32 4294901760, %v234_v18  ;;  %v1840_v23 = vld [vmem:[%s1798_s19 + $0x58] sm:$0xff]  ;;  %v1846_v25 = vld [vmem:[%s1798_s19 + $0x50] sm:$0xff]  ;;  %1231 = vmatpush3.msra.mxu0 %v1813_v8  ;;  %v1853_v27 = vsub.f32 %v222_v3, %v1813_v8  ;;  %v1856_v28 = vand.u32 4294901760, %v1843_v24  ;;  %v1862_v30 = vld [vmem:[%s1798_s19 + $0xc8] sm:$0xff] }
  0x43   : > { %v1850_v26 = vand.u32 4294901760, %v1840_v23  ;;  %v1865_v31 = vld [vmem:[%s1798_s19 + $0x48] sm:$0xff]  ;;  %v1868_v32 = vld [vmem:[%s1798_s19 + $0xc0] sm:$0xff]  ;;  %1232 = vmatprep.subr.mxu0 %v1815_v9  ;;  %v2510_v33 = vand.u32 4294901760, %v1837_v22  ;;  %v1873_v34 = vand.u32 4294901760, %v1846_v25  ;;  %v1876_v35 = vsub.f32 %v221_v10, %v1820_v13  ;;  %v1916_v50 = vld [vmem:[%s1798_s19 + $0xb8] sm:$0xff] }
  0x44   : > { %v1879_v36 = vand.u32 4294901760, %v1862_v30  ;;  %1233 = vmatpush3.msra.mxu0 %v1820_v13  ;;  %v2507_v37 = vand.u32 4294901760, %v1853_v27  ;;  %v2506_v38 = vand.u32 4294901760, %v1859_v29  ;;  %v1885_v39 = vsub.f32 %v236_v11, %v1822_v14  ;;  %v1891_v41 = vld [vmem:[%s1798_s19 + $0x40] sm:$0xff]  ;;  %v1927_v55 = vld [vmem:[%s1798_s19 + $0x38] sm:$0xff]  ;;  %v1935_v60 = vld [vmem:[%s1798_s19 + $0xb0] sm:$0xff] }
  0x45   : > { %2574 = vst [vmem:[#allocation11_spill] sm:$0xff] %v1873_v34  ;;  %v1888_v40 = vand.u32 4294901760, %v1865_v31  ;;  %1234 = vmatprep.subr.mxu0 %v1822_v14  ;;  %v478_v42 = vsub.f32 %v1837_v22, %v2510_v33  ;;  %v2504_v43 = vand.u32 4294901760, %v1876_v35  ;;  %v1899_v44 = vsub.f32 %v220_v12, %v1824_v15  ;;  %v1948_v2 = vld [vmem:[%s1798_s19 + $0x30] sm:$0xff]  ;;  %v1961_v12 = vld [vmem:[%s1798_s19 + $0xa8] sm:$0xff]  ;;  %s1571_s25 = scalar_lea.vmem %s1128_s23, 16 }
  0x46   : > { %2575 = vst [vmem:[#allocation12_spill] sm:$0xff] %v1879_v36  ;;  %v1902_v45 = vand.u32 4294901760, %v1868_v32  ;;  %1235 = vmatpush3.msra.mxu0 %v1824_v15  ;;  %v366_v46 = vsub.f32 %v1853_v27, %v2507_v37  ;;  %v485_v47 = vsub.f32 %v1859_v29, %v2506_v38  ;;  %v2503_v48 = vand.u32 4294901760, %v1885_v39  ;;  %v2044_v38 = vld [vmem:[%s1798_s19 + $0x18] sm:$0xff]  ;;  %v2069_v6 = vld [vmem:[%s1798_s19 + $0x10] sm:$0xff]  ;;  %v2081_v5 = vld [vmem:[%s1798_s19 + $0x88] sm:$0xff]  ;;  %p1572_p3 = scmp.ne.s32.totalorder %s1128_s23, %s1571_s25 }
  0x47   : > { %2576 = vst [vmem:[#allocation13_spill] sm:$0xff] %v1888_v40  ;;  %v1913_v49 = vsub.f32 %v235_v16, %v1830_v19  ;;  %1236 = vmatprep.subr.mxu0 %v1830_v19  ;;  %v479_v51 = vand.u32 4294901760, %v478_v42  ;;  %v373_v52 = vsub.f32 %v1876_v35, %v2504_v43  ;;  %v2501_v53 = vand.u32 4294901760, %v1899_v44  ;;  %p2669_p13 = scmp.ne.s32.totalorder %s2568_s21, 0  ;;  %s1663_s3 = smov [#allocation7]  }
  0x48   : > { %2577 = vst [vmem:[#allocation14_spill] sm:$0xff] %v1902_v45  ;;  %v1924_v54 = vand.u32 4294901760, %v1891_v41  ;;  %1237 = vmatpush3.msra.mxu0 %v1832_v20  ;;  %v367_v56 = vand.u32 4294901760, %v366_v46  ;;  %v486_v57 = vand.u32 4294901760, %v485_v47  ;;  %v492_v58 = vsub.f32 %v1885_v39, %v2503_v48  ;;  %v2032_v48 = vld [vmem:[%s1798_s19 + $0x98] sm:$0xff]  ;;  %s1575_s4 = sshll.u32 %s1663_s3, 4  ;;  %s1576_s4 = int_to_ptr.vmem [resolvable:$false] %s1575_s4 }
  0x49   : > { %v2500_v59 = vand.u32 4294901760, %v1913_v49  ;;  %1238 = vmatprep.subr.mxu0 %v1834_v21  ;;  %1265 = vmatprep.subr.mxu1 %v479_v51  ;;  %v374_v61 = vand.u32 4294901760, %v373_v52  ;;  %v380_v62 = vsub.f32 %v1899_v44, %v2501_v53  ;;  %v1942_v63 = vsub.f32 %v219_v17, %v1832_v20  ;;  %p1573_p5 = pnand %p1572_p3, %p2669_p13  ;;  %s1577_s6 = scalar_lea.vmem %s1576_s4, 32 }
  0x4a   : > { %2578 = vst [vmem:[#allocation15_spill] sm:$0xff] %v1924_v54  ;;  %v1945_v0 = vand.u32 4294901760, %v1916_v50  ;;  %1239 = vmatpush3.msra.mxu0 %v1850_v26  ;;  %1266 = vmatpush3.msra.mxu1 %v367_v56  ;;  %v493_v3 = vand.u32 4294901760, %v492_v58  ;;  %v1955_v10 = vsub.f32 %v234_v18, %v1834_v21  ;;  %v1958_v11 = vand.u32 4294901760, %v1927_v55  ;;  %v1973_v18 = vld [vmem:[%s1798_s19 + $0x28] sm:$0xff]  ;;  %p1578_p12 = scmp.lt.s32.totalorder %s1128_s23, %s1576_s4  ;;  %p1579_p7 = scmp.lt.s32.totalorder %s1577_s6, %s1571_s25 }
  0x4b   : > { %v499_v4 = vsub.f32 %v1913_v49, %v2500_v59  ;;  %1240 = vmatprep.subr.mxu0 %v1856_v28  ;;  %1267 = vmatprep.subr.mxu1 %v486_v57  ;;  %v381_v16 = vand.u32 4294901760, %v380_v62  ;;  %v2498_v17 = vand.u32 4294901760, %v1942_v63  ;;  %v1967_v42 = vsub.f32 %v1840_v23, %v1850_v26  ;;  %p1574_p1 = pneg %p1573_p5 }
  0x4c   : > { %2579 = vst [vmem:[#allocation16_spill] sm:$0xff] %v1945_v0  ;;  %2580 = vst [vmem:[#allocation17_spill] sm:$0xff] %v1958_v11  ;;  %v1970_v46 = vand.u32 4294901760, %v1935_v60  ;;  %1241 = vmatpush3.msra.mxu0 %v1873_v34  ;;  %1268 = vmatpush3.msra.mxu1 %v374_v61  ;;  %v2499_v51 = vand.u32 4294901760, %v1955_v10  ;;  %v1979_v52 = vsub.f32 %v1843_v24, %v1856_v28  ;;  %v1982_v56 = vand.u32 4294901760, %v1948_v2  ;;  %v1997_v61 = vld [vmem:[%s1798_s19 + $0xa0] sm:$0xff]  ;;  %p1580_p8 = por %p1579_p7, %p1578_p12 }
  0x4d   : > { %v500_v47 = vand.u32 4294901760, %v499_v4  ;;  %1242 = vmatprep.subr.mxu0 %v1879_v36  ;;  %1269 = vmatprep.subr.mxu1 %v493_v3  ;;  %v387_v23 = vsub.f32 %v1942_v63, %v2498_v17  ;;  %v2502_v57 = vand.u32 4294901760, %v1967_v42  ;;  %v1991_v58 = vsub.f32 %v1846_v25, %v1873_v34 }
  0x4e   : > { %2581 = vst [vmem:[#allocation18_spill] sm:$0xff] %v1970_v46  ;;  %2582 = vst [vmem:[#allocation19_spill] sm:$0xff] %v1982_v56  ;;  %v1994_v24 = vand.u32 4294901760, %v1961_v12  ;;  %1243 = vmatpush3.msra.mxu0 %v1888_v40  ;;  %1270 = vmatpush3.msra.mxu1 %v381_v16  ;;  %v506_v62 = vsub.f32 %v1955_v10, %v2499_v51  ;;  %v2505_v3 = vand.u32 4294901760, %v1979_v52  ;;  %v2009_v25 = vand.u32 4294901760, %v1973_v18  ;;  %p1581_p9 = pnand %p1580_p8, %p1574_p1 }
  0x4f   : > { %v2006_v4 = vsub.f32 %v1862_v30, %v1879_v36  ;;  %1244 = vmatprep.subr.mxu0 %v1902_v45  ;;  %1271 = vmatprep.subr.mxu1 %v500_v47  ;;  %v388_v17 = vand.u32 4294901760, %v387_v23  ;;  %v394_v16 = vsub.f32 %v1967_v42, %v2502_v57  ;;  %v2508_v51 = vand.u32 4294901760, %v1991_v58  ;;  %v2021_v30 = vld [vmem:[%s1798_s19 + $0x20] sm:$0xff]  ;;  %v206_v36 = vld [vmem:[#allocation2] sm:$0x3] }
  0x50   : > { %2583 = vst [vmem:[#allocation20_spill] sm:$0xff] %v1994_v24  ;;  %2584 = vst [vmem:[#allocation21_spill] sm:$0xff] %v2009_v25  ;;  %v2018_v59 = vsub.f32 %v1865_v31, %v1888_v40  ;;  %1245 = vmatpush3.msra.mxu0 %v1924_v54  ;;  %v507_v53 = vand.u32 4294901760, %v506_v62  ;;  %v513_v47 = vsub.f32 %v1979_v52, %v2505_v3  ;;  %v2029_v57 = vand.u32 4294901760, %v1997_v61 }
  0x51   : > { %v2509_v23 = vand.u32 4294901760, %v2006_v4  ;;  %1272 = vmatpush3.msra.mxu1 %v388_v17  ;;  %1246 = vmatprep.subr.mxu0 %v1945_v0  ;;  %v395_v31 = vand.u32 4294901760, %v394_v16  ;;  %v401_v62 = vsub.f32 %v1991_v58, %v2508_v51  ;;  %v2041_v3 = vsub.f32 %v1868_v32, %v1902_v45  ;;  %v2058_v32 = vld [vmem:[%s1798_s19 + $0x90] sm:$0xff] }
  0x52   : > { %2585 = vst [vmem:[#allocation22_spill] sm:$0xff] %v2029_v57  ;;  %v2511_v43 = vand.u32 4294901760, %v2018_v59  ;;  %1273 = vmatprep.subr.mxu1 %v507_v53  ;;  %1247 = vmatpush3.msra.mxu0 %v1958_v11  ;;  %v514_v17 = vand.u32 4294901760, %v513_v47  ;;  %v2051_v37 = vand.u32 4294901760, %v2021_v30  ;;  %v2055_v51 = vsub.f32 %v1891_v41, %v1924_v54 }
  0x53   : > { %v520_v16 = vsub.f32 %v2006_v4, %v2509_v23  ;;  %1274 = vmatpush3.msra.mxu1 %v395_v31  ;;  %1248 = vmatprep.subr.mxu0 %v1970_v46  ;;  %v402_v53 = vand.u32 4294901760, %v401_v62  ;;  %v2066_v33 = vand.u32 4294901760, %v2032_v48  ;;  %v2075_v62 = vsub.f32 %v1916_v50, %v1945_v0 }
  0x54   : > { %2586 = vst [vmem:[#allocation23_spill] sm:$0xff] %v2051_v37  ;;  %v408_v47 = vsub.f32 %v2018_v59, %v2511_v43  ;;  %1275 = vmatprep.subr.mxu1 %v514_v17  ;;  %1249 = vmatpush3.msra.mxu0 %v1982_v56  ;;  %v2078_v43 = vand.u32 4294901760, %v2044_v38  ;;  %v2589_v17 = vand.u32 4294901760, %v2041_v3  ;;  %v2089_v31 = vsub.f32 %v1927_v55, %v1958_v11  ;;  %v2107_v55 = vld [vmem:[%s1798_s19 + $0x8] sm:$0xff] }
  0x55   : > { %2587 = vst [vmem:[#allocation24_spill] sm:$0xff] %v2066_v33  ;;  %v521_v41 = vand.u32 4294901760, %v520_v16  ;;  %1276 = vmatpush3.msra.mxu1 %v402_v53  ;;  %1250 = vmatprep.subr.mxu0 %v1994_v24  ;;  %v2092_v50 = vand.u32 4294901760, %v2058_v32  ;;  %v2590_v53 = vand.u32 4294901760, %v2055_v51  ;;  %v2104_v54 = vand.u32 4294901760, %v2069_v6 }
  0x56   : > { %2588 = vst [vmem:[#allocation25_spill] sm:$0xff] %v2078_v43  ;;  %v409_v23 = vand.u32 4294901760, %v408_v47  ;;  %v527_v16 = vsub.f32 %v2041_v3, %v2589_v17  ;;  %1251 = vmatpush3.msra.mxu0 %v2009_v25  ;;  %v2101_v17 = vsub.f32 %v1935_v60, %v1970_v46  ;;  %v2116_v47 = vand.u32 4294901760, %v2081_v5  ;;  %v2119_v60 = vld [vmem:[%s1798_s19 + $0x80] sm:$0xff] }
  0x57   : > { %1277 = vmatprep.subr.mxu1 %v521_v41  ;;  %v415_v0 = vsub.f32 %v2055_v51, %v2590_v53  ;;  %2592 = vst [vmem:[#allocation27_spill] sm:$0xff] %v2104_v54  ;;  %1252 = vmatprep.subr.mxu0 %v2029_v57  ;;  %v2113_v53 = vsub.f32 %v1948_v2, %v1982_v56  ;;  %v2596_v2 = vand.u32 4294901760, %v2089_v31  ;;  %v2151_v40 = vand.u32 4294901760, %v2119_v60 }
  0x58   : > { %2591 = vst [vmem:[#allocation26_spill] sm:$0xff] %v2101_v17  ;;  %1278 = vmatpush3.msra.mxu1 %v409_v23  ;;  %v528_v41 = vand.u32 4294901760, %v527_v16  ;;  %2593 = vst [vmem:[#allocation28_spill] sm:$0xff] %v2116_v47  ;;  %1253 = vmatpush3.msra.mxu0 %v2051_v37  ;;  %v2594_v23 = vand.u32 4294901760, %v2075_v62  ;;  %v2128_v11 = vsub.f32 %v1961_v12, %v1994_v24  ;;  %v2143_v16 = vld [vmem:[%s1798_s19] sm:$0xff] }
  0x59   : > { %v416_v46 = vand.u32 4294901760, %v415_v0  ;;  %1254 = vmatprep.subr.mxu0 %v2066_v33  ;;  %v422_v56 = vsub.f32 %v2089_v31, %v2596_v2  ;;  %v2136_v0 = vand.u32 4294901760, %v2107_v55 }
  0x5a   : > { %v534_v45 = vsub.f32 %v2075_v62, %v2594_v23  ;;  %2595 = vst [vmem:[#allocation29_spill] sm:$0xff] %v2128_v11  ;;  %1279 = vmatprep.subr.mxu1 %v528_v41  ;;  %v2140_v23 = vsub.f32 %v1973_v18, %v2009_v25  ;;  %1255 = vmatpush3.msra.mxu0 %v2078_v43  ;;  %v2598_v41 = vand.u32 4294901760, %v2101_v17  ;;  %v2538_v2 = vand.u32 4294901760, %v2128_v11 }
  0x5b   : > { %2597 = vst [vmem:[#allocation30_spill] sm:$0xff] %v2136_v0  ;;  %1280 = vmatpush3.msra.mxu1 %v416_v46  ;;  %v423_v34 = vand.u32 4294901760, %v422_v56  ;;  %1256 = vmatprep.subr.mxu0 %v2092_v50  ;;  %v2599_v18 = vand.u32 4294901760, %v2113_v53  ;;  %v2160_v25 = vsub.f32 %v1997_v61, %v2029_v57  ;;  %v2601_v57 = vsub.s32 0, %v1804_v1 }
  0x5c   : > { %v535_v12 = vand.u32 4294901760, %v534_v45  ;;  %v541_v24 = vsub.f32 %v2101_v17, %v2598_v41  ;;  %1257 = vmatpush3.msra.mxu0 %v2104_v54  ;;  %v548_v56 = vsub.f32 %v2128_v11, %v2538_v2  ;;  %v2167_v17 = vand.u32 4294901760, %v2143_v16 }
  0x5d   : > { %v429_v46 = vsub.f32 %v2113_v53, %v2599_v18  ;;  %v2171_v18 = vsub.f32 %v2021_v30, %v2051_v37  ;;  %1258 = vmatprep.subr.mxu0 %v2116_v47  ;;  %v2600_v61 = vand.u32 4294901760, %v2140_v23  ;;  %v243_v2 = vrot.slane %v206_v36, %v2601_v57 }
  0x5e   : > { %1281 = vmatprep.subr.mxu1 %v535_v12  ;;  %v542_v41 = vand.u32 4294901760, %v541_v24  ;;  %v2544_v12 = vand.u32 4294901760, %v2160_v25  ;;  %v549_v11 = vand.u32 4294901760, %v548_v56  ;;  %1259 = vmatpush3.msra.mxu0 %v2136_v0  ;;  %v2186_v37 = vsub.f32 %v2032_v48, %v2066_v33 }
  0x5f   : > { %1282 = vmatpush3.msra.mxu1 %v423_v34  ;;  %v430_v45 = vand.u32 4294901760, %v429_v46  ;;  %v436_v24 = vsub.f32 %v2140_v23, %v2600_v61  ;;  %v2543_v30 = vand.u32 4294901760, %v2171_v18  ;;  %v2602_v34 = vsub.s32 1, %v1804_v1  ;;  %1260 = vmatprep.subr.mxu0 %v2151_v40 }
  0x60   : > { %1283 = vmatprep.subr.mxu1 %v542_v41  ;;  %v555_v57 = vsub.f32 %v2160_v25, %v2544_v12  ;;  %v2192_v41 = vand.u32 4294901760, %v243_v2  ;;  %v2196_v56 = vsub.f32 %v2044_v38, %v2078_v43  ;;  %1261 = vmatpush3.msra.mxu0 %v2167_v17  ;;  %v2545_v48 = vand.u32 4294901760, %v2186_v37 }
  0x61   : > { %v247_v46 = vrot.slane %v206_v36, %v2602_v34  ;;  %1284 = vmatpush3.msra.mxu1 %v430_v45  ;;  %v437_v61 = vand.u32 4294901760, %v436_v24  ;;  %v443_v1 = vsub.f32 %v2171_v18, %v2543_v30  ;;  %v2207_v45 = vsub.f32 %v2058_v32, %v2092_v50  ;;  %1300 = vmatprep.subr.mxu0 %v1837_v22 }
  0x62   : > { %2603 = vst [vmem:[#allocation31_spill] sm:$0xff] %v2192_v41  ;;  %1285 = vmatprep.subr.mxu1 %v549_v11  ;;  %v556_v24 = vand.u32 4294901760, %v555_v57  ;;  %v2211_v38 = vsub.f32 %v243_v2, %v2192_v41  ;;  %v2546_v11 = vand.u32 4294901760, %v2196_v56  ;;  %v2216_v34 = vsub.f32 %v2069_v6, %v2104_v54 }
  0x63   : > { %v2202_v36 = vand.u32 4294901760, %v247_v46  ;;  %1286 = vmatpush3.msra.mxu1 %v437_v61  ;;  %v444_v30 = vand.u32 4294901760, %v443_v1  ;;  %v562_v32 = vsub.f32 %v2186_v37, %v2545_v48  ;;  %v2551_v61 = vand.u32 4294901760, %v2207_v45 }
  0x64   : > { %1287 = vmatprep.subr.mxu1 %v556_v24  ;;  %v450_v6 = vsub.f32 %v2196_v56, %v2546_v11  ;;  %v2241_v2 = vsub.f32 %v2107_v55, %v2136_v0  ;;  %v2605_v11 = vand.u32 4294901760, %v2211_v38  ;;  %v2256_v0 = vsub.f32 %v2119_v60, %v2151_v40 }
  0x65   : > { %2604 = vst [vmem:[#allocation32_spill] sm:$0xff] %v2202_v36  ;;  %v2219_v12 = vsub.f32 %v247_v46, %v2202_v36  ;;  %587 = vmatprep.mubr.f32.mxu1 %v2202_v36  ;;  %v2233_v46 = vsub.f32 %v2081_v5, %v2116_v47  ;;  %1288 = vmatpush3.msra.mxu1 %v444_v30  ;;  %v563_v48 = vand.u32 4294901760, %v562_v32  ;;  %v2606_v5 = vand.u32 4294901760, %v2216_v34 }
  0x66   : > { %v569_v24 = vsub.f32 %v2207_v45, %v2551_v61  ;;  %v355_v57 = vsub.f32 %v2211_v38, %v2605_v11  ;;  %v451_v36 = vand.u32 4294901760, %v450_v6  ;;  %v2558_v55 = vand.u32 4294901760, %v2241_v2 }
  0x67   : > { %v457_v30 = vsub.f32 %v2216_v34, %v2606_v5  ;;  %v2559_v1 = vand.u32 4294901760, %v2233_v46  ;;  %v2607_v32 = vand.u32 4294901760, %v2219_v12  ;;  %1289 = vmatprep.subr.mxu1 %v563_v48  ;;  %v2263_v54 = vsub.f32 %v2143_v16, %v2167_v17 }
  0x68   : > { %v570_v61 = vand.u32 4294901760, %v569_v24  ;;  %v356_v11 = vand.u32 4294901760, %v355_v57  ;;  %1290 = vmatpush3.msra.mxu1 %v451_v36  ;;  %v464_v48 = vsub.f32 %v2241_v2, %v2558_v55  ;;  %v2557_v60 = vand.u32 4294901760, %v2256_v0  ;;  %v2622_v55 = vld [vmem:[#allocation22_spill] sm:$0xff] }
  0x69   : > { %v349_v47 = vsub.f32 %v2219_v12, %v2607_v32  ;;  %v458_v6 = vand.u32 4294901760, %v457_v30  ;;  %v576_v5 = vsub.f32 %v2233_v46, %v2559_v1  ;;  %2608 = vst [vmem:[#allocation33_spill] sm:$0xff] %v2263_v54  ;;  %v2556_v36 = vand.u32 4294901760, %v2263_v54  ;;  %v2623_v1 = vld [vmem:[#allocation23_spill] sm:$0xff] }
  0x6a   : > { %1291 = vmatprep.subr.mxu1 %v570_v61  ;;  %v465_v24 = vand.u32 4294901760, %v464_v48  ;;  %v583_v30 = vsub.f32 %v2256_v0, %v2557_v60  ;;  %v2613_v48 = vld [vmem:[#allocation29_spill] sm:$0xff] }
  0x6b   : > { %v350_v32 = vand.u32 4294901760, %v349_v47  ;;  %1292 = vmatpush3.msra.mxu1 %v458_v6  ;;  %v577_v57 = vand.u32 4294901760, %v576_v5  ;;  %v471_v47 = vsub.f32 %v2263_v54, %v2556_v36  ;;  %v2610_v6 = vld [vmem:[#allocation26_spill] sm:$0xff]  ;;  %v2611_v5 = vld [vmem:[#allocation12_spill] sm:$0xff]  ;;  %v2621_v60 = vld [vmem:[#allocation21_spill] sm:$0xff] }
  0x6c   : > { %v584_v16 = vand.u32 4294901760, %v583_v30  ;;  %v2616_v30 = vld [vmem:[#allocation16_spill] sm:$0xff] }
  0x6d   : > { %351 = vmatprep.mubr.f32.mxu0 %v350_v32  ;;  %1293 = vmatprep.subr.mxu1 %v577_v57  ;;  %v472_v61 = vand.u32 4294901760, %v471_v47  ;;  %v2612_v32 = vld [vmem:[#allocation13_spill] sm:$0xff]  ;;  %v2614_v57 = vld [vmem:[#allocation14_spill] sm:$0xff]  ;;  %v2620_v36 = vld [vmem:[#allocation20_spill] sm:$0xff] }
  0x6e   : > { %357 = vmatmul.mubr.f32.vlgmr.msra.gmra.mxu0 %v356_v11  ;;  %1294 = vmatpush3.msra.mxu1 %v465_v24  ;;  %v2609_v11 = vld [vmem:[#allocation11_spill] sm:$0xff]  ;;  %v2617_v47 = vld [vmem:[#allocation17_spill] sm:$0xff] }
  0x6f   : > { %1301 = vmatpush3.msra.mxu0 %v1853_v27  ;;  %724 = vmatprep.mubr.f32.mxu0 %v2219_v12  ;;  %v2615_v24 = vld [vmem:[#allocation15_spill] sm:$0xff] }
  0x70   : > { %1302 = vmatprep.subr.mxu0 %v1859_v29  ;;  %1295 = vmatprep.subr.mxu1 %v584_v16  ;;  %v2618_v16 = vld [vmem:[#allocation18_spill] sm:$0xff] }
  0x71   : > { %1303 = vmatpush3.msra.mxu0 %v1876_v35  ;;  %1296 = vmatpush3.msra.mxu1 %v472_v61  ;;  %v2619_v61 = vld [vmem:[#allocation19_spill] sm:$0xff] }
  0x72   : > { %1304 = vmatprep.subr.mxu0 %v1885_v39  ;;  %589 = vmatmul.mubr.f32.vlgmr.msra.gmra.mxu1 %v2192_v41  ;;  %v2624_v41 = vand.u32 4294901760, %v1837_v22  ;;  %v2631_v22 = vld [vmem:[#allocation30_spill] sm:$0xff] }
  0x73   : > { %1305 = vmatpush3.msra.mxu0 %v1899_v44  ;;  %1335 = vmatprep.subr.mxu1 %v1811_v7 }
  0x74   : > { %1306 = vmatprep.subr.mxu0 %v1913_v49  ;;  %1336 = vmatpush3.msra.mxu1 %v1813_v8 }
  0x75   : > { %1307 = vmatpush3.msra.mxu0 %v1942_v63  ;;  %1337 = vmatprep.subr.mxu1 %v1815_v9 }
  0x76   : > { %1308 = vmatprep.subr.mxu0 %v1955_v10  ;;  %1338 = vmatpush3.msra.mxu1 %v1820_v13 }
  0x77   : > { %1309 = vmatpush3.msra.mxu0 %v1967_v42  ;;  %1339 = vmatprep.subr.mxu1 %v1822_v14 }
  0x78   : > { %1310 = vmatprep.subr.mxu0 %v1979_v52  ;;  %1340 = vmatpush3.msra.mxu1 %v1824_v15 }
  0x79   : > { %1311 = vmatpush3.msra.mxu0 %v1991_v58  ;;  %1341 = vmatprep.subr.mxu1 %v1830_v19 }
  0x7a   : > { %1312 = vmatprep.subr.mxu0 %v2006_v4  ;;  %1342 = vmatpush3.msra.mxu1 %v1832_v20 }
  0x7b   : > { %1313 = vmatpush3.msra.mxu0 %v2018_v59  ;;  %1343 = vmatprep.subr.mxu1 %v1834_v21 }
  0x7c   : > { %1314 = vmatprep.subr.mxu0 %v2041_v3  ;;  %1344 = vmatpush3.msra.mxu1 %v1850_v26 }
  0x7d   : > { %1315 = vmatpush3.msra.mxu0 %v2055_v51  ;;  %1345 = vmatprep.subr.mxu1 %v1856_v28 }
  0x7e   : > { %1316 = vmatprep.subr.mxu0 %v2075_v62  ;;  %1346 = vmatpush3.msra.mxu1 %v2609_v11 }
  0x7f   : > { %1317 = vmatpush3.msra.mxu0 %v2089_v31  ;;  %1347 = vmatprep.subr.mxu1 %v2611_v5 }
  0x80   : > { %1318 = vmatprep.subr.mxu0 %v2610_v6  ;;  %1348 = vmatpush3.msra.mxu1 %v2612_v32 }
  0x81   : > { %1319 = vmatpush3.msra.mxu0 %v2113_v53  ;;  %1349 = vmatprep.subr.mxu1 %v2614_v57 }
  0x82   : > { %1320 = vmatprep.subr.mxu0 %v2613_v48  ;;  %1350 = vmatpush3.msra.mxu1 %v2615_v24 }
  0x83   : > { %1321 = vmatpush3.msra.mxu0 %v2140_v23  ;;  %1351 = vmatprep.subr.mxu1 %v2616_v30 }
  0x84   : > { %1322 = vmatprep.subr.mxu0 %v2160_v25  ;;  %1352 = vmatpush3.msra.mxu1 %v2617_v47 }
  0x85   : > { %1323 = vmatpush3.msra.mxu0 %v2171_v18  ;;  %1353 = vmatprep.subr.mxu1 %v2618_v16 }
  0x86   : > { %1324 = vmatprep.subr.mxu0 %v2186_v37  ;;  %1354 = vmatpush3.msra.mxu1 %v2619_v61 }
  0x87   : > { %1325 = vmatpush3.msra.mxu0 %v2196_v56  ;;  %1355 = vmatprep.subr.mxu1 %v2620_v36 }
  0x88   : > { %1326 = vmatprep.subr.mxu0 %v2207_v45  ;;  %1356 = vmatpush3.msra.mxu1 %v2621_v60  ;;  %v2625_v60 = vand.u32 4294901760, %v1853_v27  ;;  %v2632_v27 = vand.u32 4294901760, %v1899_v44  ;;  %v2638_v44 = vand.u32 4294901760, %v1967_v42  ;;  %v2654_v42 = vand.u32 4294901760, %v2196_v56 }
  0x89   : > { %1327 = vmatpush3.msra.mxu0 %v2216_v34  ;;  %1357 = vmatprep.subr.mxu1 %v2622_v55  ;;  %v2627_v55 = vld [vmem:[#allocation27_spill] sm:$0xff] }
  0x8a   : > { %1328 = vmatprep.subr.mxu0 %v2233_v46  ;;  %1358 = vmatpush3.msra.mxu1 %v2623_v1  ;;  %v2626_v1 = vand.u32 4294901760, %v1859_v29  ;;  %v2633_v29 = vand.u32 4294901760, %v1913_v49  ;;  %v2639_v49 = vand.u32 4294901760, %v1979_v52  ;;  %v2656_v52 = vand.u32 4294901760, %v2216_v34 }
  0x8b   : > { %1329 = vmatpush3.msra.mxu0 %v2241_v2  ;;  %1359 = vmatprep.subr.mxu1 %v2066_v33  ;;  %v2628_v33 = vand.u32 4294901760, %v1876_v35  ;;  %v2634_v35 = vand.u32 4294901760, %v2219_v12  ;;  %v2667_v12 = vld [vmem:[#allocation24_spill] sm:$0xff] }
  0x8c   : > { %1330 = vmatprep.subr.mxu0 %v2256_v0  ;;  %1360 = vmatpush3.msra.mxu1 %v2078_v43  ;;  %v2630_v43 = vand.u32 4294901760, %v1885_v39  ;;  %v2636_v39 = vand.u32 4294901760, %v2211_v38 }
  0x8d   : > { %1331 = vmatpush3.msra.mxu0 %v2263_v54  ;;  %1361 = vmatprep.subr.mxu1 %v2092_v50  ;;  %v2629_v54 = vld [vmem:[#allocation28_spill] sm:$0xff] }
  0x8e   : > { %727 = vmatmul.mubr.f32.vlgmr.msra.gmra.mxu0 %v2211_v38  ;;  %1370 = vmatprep.subr.mxu0 %v2624_v41  ;;  %v2668_v41 = vld [vmem:[#allocation25_spill] sm:$0xff] }
  0x8f   : > { %1371 = vmatpush3.msra.mxu0 %v2625_v60  ;;  %1362 = vmatpush3.msra.mxu1 %v2627_v55 }
  0x90   : > { %1372 = vmatprep.subr.mxu0 %v2626_v1  ;;  %1363 = vmatprep.subr.mxu1 %v2629_v54 }
  0x91   : > { %1373 = vmatpush3.msra.mxu0 %v2628_v33  ;;  %1364 = vmatpush3.msra.mxu1 %v2631_v22  ;;  %v2635_v33 = vand.u32 4294901760, %v1942_v63  ;;  %v2640_v63 = vand.u32 4294901760, %v1991_v58  ;;  %v2658_v58 = vand.u32 4294901760, %v2241_v2 }
  0x92   : > { %1374 = vmatprep.subr.mxu0 %v2630_v43  ;;  %1365 = vmatprep.subr.mxu1 %v2151_v40  ;;  %v2637_v43 = vand.u32 4294901760, %v1955_v10  ;;  %v2641_v10 = vand.u32 4294901760, %v2006_v4  ;;  %v2660_v4 = vand.u32 4294901760, %v2256_v0  ;;  %v1662_v0 = vmov 0.0  }
  0x93   : > { %1375 = vmatpush3.msra.mxu0 %v2632_v27  ;;  %1366 = vmatpush3.msra.mxu1 %v2167_v17  ;;  %204 = vst [vmem:[%s2447_s18] sm:$0x1] %v1662_v0 }
  0x94   : > { %1376 = vmatprep.subr.mxu0 %v2633_v29  ;;  %831 = vmatprep.mubr.f32.mxu1 %v2634_v35 }
  0x95   : > { %1377 = vmatpush3.msra.mxu0 %v2635_v33  ;;  %835 = vmatmul.mubr.f32.vlgmr.msra.gmra.mxu1 %v2636_v39 }
  0x96   : > { %1378 = vmatprep.subr.mxu0 %v2637_v43  ;;  %1405 = vmatprep.subr.mxu1 %v1811_v7  ;;  %v2642_v7 = vand.u32 4294901760, %v2018_v59  ;;  %v2653_v59 = vand.u32 4294901760, %v2186_v37  ;;  %v2657_v37 = vand.u32 4294901760, %v2233_v46 }
  0x97   : > { %1379 = vmatpush3.msra.mxu0 %v2638_v44  ;;  %1406 = vmatpush3.msra.mxu1 %v1813_v8  ;;  %v2643_v8 = vand.u32 4294901760, %v2041_v3  ;;  %v2659_v3 = vld [vmem:[#allocation21_spill] sm:$0xff] }
  0x98   : > { %1380 = vmatprep.subr.mxu0 %v2639_v49  ;;  %1407 = vmatprep.subr.mxu1 %v1815_v9  ;;  %v2644_v9 = vand.u32 4294901760, %v2055_v51  ;;  %v2655_v51 = vand.u32 4294901760, %v2207_v45 }
  0x99   : > { %1381 = vmatpush3.msra.mxu0 %v2640_v63  ;;  %1408 = vmatpush3.msra.mxu1 %v1820_v13  ;;  %v2645_v13 = vand.u32 4294901760, %v2075_v62 }
  0x9a   : > { %1382 = vmatprep.subr.mxu0 %v2641_v10  ;;  %1409 = vmatprep.subr.mxu1 %v1822_v14  ;;  %v2646_v14 = vand.u32 4294901760, %v2089_v31  ;;  %v2662_v31 = vld [vmem:[#allocation33_spill] sm:$0xff] }
  0x9b   : > { %1383 = vmatpush3.msra.mxu0 %v2642_v7  ;;  %1410 = vmatpush3.msra.mxu1 %v1824_v15  ;;  %v2647_v15 = vand.u32 4294901760, %v2610_v6  ;;  %v2663_v62 = vand.u32 4294901760, %v2662_v31 }
  0x9c   : > { %1384 = vmatprep.subr.mxu0 %v2643_v8  ;;  %1411 = vmatprep.subr.mxu1 %v1830_v19  ;;  %v2648_v19 = vand.u32 4294901760, %v2113_v53  ;;  %v2664_v53 = vld [vmem:[#allocation32_spill] sm:$0xff] }
  0x9d   : > { %1385 = vmatpush3.msra.mxu0 %v2644_v9  ;;  %1412 = vmatpush3.msra.mxu1 %v1832_v20  ;;  %v2649_v20 = vand.u32 4294901760, %v2613_v48 }
  0x9e   : > { %1386 = vmatprep.subr.mxu0 %v2645_v13  ;;  %1413 = vmatprep.subr.mxu1 %v1834_v21  ;;  %v2650_v21 = vand.u32 4294901760, %v2140_v23  ;;  %v2665_v23 = vld [vmem:[#allocation23_spill] sm:$0xff] }
  0x9f   : > { %1387 = vmatpush3.msra.mxu0 %v2646_v14  ;;  %1414 = vmatpush3.msra.mxu1 %v1850_v26  ;;  %v2651_v26 = vand.u32 4294901760, %v2160_v25  ;;  %v2661_v25 = vld [vmem:[#allocation22_spill] sm:$0xff] }
  0xa0   : > { %1388 = vmatprep.subr.mxu0 %v2647_v15  ;;  %1415 = vmatprep.subr.mxu1 %v1856_v28  ;;  %v2652_v28 = vand.u32 4294901760, %v2171_v18  ;;  %v2666_v18 = vld [vmem:[#allocation31_spill] sm:$0xff] }
  0xa1   : > { %1389 = vmatpush3.msra.mxu0 %v2648_v19  ;;  %1416 = vmatpush3.msra.mxu1 %v2609_v11 }
  0xa2   : > { %1390 = vmatprep.subr.mxu0 %v2649_v20  ;;  %1417 = vmatprep.subr.mxu1 %v2611_v5 }
  0xa3   : > { %1391 = vmatpush3.msra.mxu0 %v2650_v21  ;;  %1418 = vmatpush3.msra.mxu1 %v2612_v32 }
  0xa4   : > { %1392 = vmatprep.subr.mxu0 %v2651_v26  ;;  %1419 = vmatprep.subr.mxu1 %v2614_v57 }
  0xa5   : > { %1393 = vmatpush3.msra.mxu0 %v2652_v28  ;;  %1420 = vmatpush3.msra.mxu1 %v2615_v24 }
  0xa6   : > { %1394 = vmatprep.subr.mxu0 %v2653_v59  ;;  %1421 = vmatprep.subr.mxu1 %v2616_v30 }
  0xa7   : > { %1395 = vmatpush3.msra.mxu0 %v2654_v42  ;;  %1422 = vmatpush3.msra.mxu1 %v2617_v47  ;;  %v205_v47 = vld [vmem:[%s2447_s18] sm:$0x1] }
  0xa8   : > { %1396 = vmatprep.subr.mxu0 %v2655_v51  ;;  %1423 = vmatprep.subr.mxu1 %v2618_v16 }
  0xa9   : > { %1397 = vmatpush3.msra.mxu0 %v2656_v52  ;;  %1424 = vmatpush3.msra.mxu1 %v2619_v61 }
  0xaa   : > { %1398 = vmatprep.subr.mxu0 %v2657_v37  ;;  %1425 = vmatprep.subr.mxu1 %v2620_v36 }
  0xab   : > { %1399 = vmatpush3.msra.mxu0 %v2658_v58  ;;  %1426 = vmatpush3.msra.mxu1 %v2659_v3 }
  0xac   : > { %1400 = vmatprep.subr.mxu0 %v2660_v4  ;;  %1427 = vmatprep.subr.mxu1 %v2661_v25 }
  0xad   : > { %1401 = vmatpush3.msra.mxu0 %v2663_v62  ;;  %1001 = vmatprep.mubr.f32.mxu0 %v2664_v53 }
  0xae   : > { %1428 = vmatpush3.msra.mxu1 %v2665_v23  ;;  %1003 = vmatmul.mubr.f32.vlgmr.msra.gmra.mxu0 %v2666_v18 }
  0xaf   : > { %1429 = vmatprep.subr.mxu1 %v2667_v12  ;;  %1105 = vmatprep.mubr.f32.mxu1 %v2664_v53 }
  0xb0   : > { %1430 = vmatpush3.msra.mxu1 %v2668_v41 }
  0xb1   : > { %1431 = vmatprep.subr.mxu1 %v2092_v50 }
  0xb2   : > { %1432 = vmatpush3.msra.mxu1 %v2627_v55 }
  0xb3   : > { %1433 = vmatprep.subr.mxu1 %v2629_v54 }
  0xb4   : > { %1434 = vmatpush3.msra.mxu1 %v2631_v22 }
  0xb5   : > { %1435 = vmatprep.subr.mxu1 %v2151_v40 }
  0xb6   : > { %1436 = vmatpush3.msra.mxu1 %v2167_v17 }
  0xb7   : > { %1107 = vmatmul.mubr.f32.vlgmr.msra.gmra.mxu1 %v2666_v18 }
 0x12e   : > { %v1262_v56 = vpop.f32.mrf.mxu0 }
 0x130   : > { %v1263_v45 = vpop.f32.mrf.mxu0 }
 0x131   : > { %v1264_v1 = vadd.f32 %v1263_v45, %v1262_v56 }
 0x132   : > { %v1297_v50 = vpop.f32.mrf.mxu1 }
 0x134   : > { %v1298_v34 = vpop.f32.mrf.mxu1 }
 0x135   : > { %v1299_v40 = vadd.f32 %v1298_v34, %v1297_v50 }
 0x137   : > { %v591_v36 = vadd.f32 %v1299_v40, %v1264_v1 }
 0x14e   : > { %v1332_v38 = vpop.f32.mrf.mxu0 }
 0x150   : > { %v1333_v2 = vpop.f32.mrf.mxu0 }
 0x151   : > { %v1334_v55 = vadd.f32 %v1333_v2, %v1332_v38 }
 0x153   : > { %v729_v6 = vadd.f32 %v1334_v55, %v591_v36 }
 0x155   : > { %v1367_v54 = vpop.f32.mrf.mxu1 }
 0x157   : > { %v1368_v17 = vpop.f32.mrf.mxu1 }
 0x158   : > { %v1369_v11 = vadd.f32 %v1368_v17, %v1367_v54 }
 0x15a   : > { %v837_v48 = vadd.f32 %v1369_v11, %v729_v6 }
 0x16e   : > { %v1402_v46 = vpop.f32.mrf.mxu0 }
 0x170   : > { %v1403_v60 = vpop.f32.mrf.mxu0 }
 0x171   : > { %v1404_v5 = vadd.f32 %v1403_v60, %v1402_v46 }
 0x173   : > { %v1005_v24 = vadd.f32 %v1404_v5, %v837_v48 }
 0x177   : > { %v1437_v32 = vpop.f32.mrf.mxu1 }
 0x179   : > { %v1438_v57 = vpop.f32.mrf.mxu1 }
 0x17a   : > { %v1439_v30 = vadd.f32 %v1438_v57, %v1437_v32 }
 0x17c   : > { %v1109_v16 = vadd.f32 %v1439_v30, %v1005_v24 }
 0x17e   : > { %v1112_v61 = vadd.f32 %v1109_v16, %v205_v47 }
 0x180   : > { %1113 = vst [vmem:[%s2447_s18] sm:$0x1] %v1112_v61 }
 0x181   : > { %1584 = shalt.err (!%p1581_p9)
}
 0x182   : > { %s1585_s12 = scalar_lea.hbm %s1125_s24, 16  ;;  %s1589_s7 = scalar_lea.hbm %s2495_s2, 32 }
 0x183   : > { %p1586_p0 = scmp.ne.s32.totalorder %s1125_s24, %s1585_s12  ;;  %p1590_p10 = scmp.lt.s32.totalorder %s1125_s24, %s2495_s2 }
 0x184   : > { %p1591_p11 = scmp.lt.s32.totalorder %s1589_s7, %s1585_s12 }
 0x185   : > { %p1587_p2 = pnand %p1586_p0, %p2669_p13 }
 0x186   : > { %p1592_p4 = por %p1591_p11, %p1590_p10 }
 0x187   : > { %p1588_p6 = pneg %p1587_p2 }
 0x189   : > { %p1593_p3 = pnand %p1592_p4, %p1588_p6 }
 0x18b   : > { %1596 = shalt.err (!%p1593_p3)
}
 0x18c   : > { %1446 = dma.vmem_to_hbm [thread:$0]  (%p2669_p13), %s1128_s23, 16, %s1125_s24, %s1115_s30  }
 0x18d PF: > { %s1139_s15 = sand.u32 1, %s1635_s9   ;;  %p2670_p5 = scmp.ne.s32.totalorder %s2569_s22, 0 }
 0x18e   : > { %p2671_p1 = scmp.ge.s32.totalorder %s1655_s14, 2  ;;  %s1140_s19 = scalar_lea.sflag [#allocation4], %s1139_s15 }
 0x190   : > { %p1457_p12 = pnand %p2671_p1, %p2670_p5 }
 0x192   : > { %p1458_p7 = pneg %p1457_p12 }
 0x194   : > { %1630 = dma.done.wait (%p1458_p7), %s1140_s19, 16  }
 0x195   : > { %1632 = vsyncadd (%p1458_p7), %s1140_s19, 4294967280  ;;  %s19_s14 = sadd.s32 1, %s1655_s14   ;;  %s2672_s9 = smov %s1639_s10 }
 0x196   : > { %p16_p8 = scmp.ge.s32.totalorder %s19_s14, 4   ;;  %s2673_s10 = smov %s1643_s11 }
 0x197   : > { %s2674_s11 = smov %s1781_s27  ;;  %s2675_s12 = smov %s1651_s13 }
 0x198   : > { %s2676_s13 = smov %s2678_s28  ;;  %18 = sbr.rel (!%p16_p8) target bundleno = 7 (0x7), region = 83 }
 0x19d   :  { %1144 = vsyncpa [#allocation3], 1 }
 0x19e   :  { %1146 = vsyncpa [#allocation3 + $0x1], 1 }
 0x19f   :  { %1147 = vsyncpa [#allocation6], 1 }
 0x1a0   :  { %1149 = vsyncpa [#allocation6 + $0x1], 1 }
 0x1a1   :  { %1150 = vsyncpa [#allocation4], 1 }
 0x1a2   :  { %1152 = vsyncpa [#allocation4 + $0x1], 1 }

</bundles_post_ra>
